<compile_context>
chip_gen: v6e
topology: v6e:2x2x1
jax: 0.10.0
libtpu: 0.0.40
codegen_flags: <defaults>
</compile_context>

<pallas_src>
import functools
import math

import jax
import jax.numpy as jnp
from jax import lax
from jax.experimental import pallas as pl
from jax.experimental.pallas import tpu as pltpu


_MIB = 1024 * 1024
# Conservative planning budget safe on every generation
# (v5e/v6e: 128 MiB physical VMEM; v7x: 64 MiB physical per TensorCore).
_VMEM_BUDGET = 48 * _MIB
_UNROLL_LAYER_LIMIT = 16


def _round_up(v, m):
    return ((v + m - 1) // m) * m


def _gelu_exact(x):
    # nn.GELU() default: exact erf-based GELU (f32 elementwise).
    return 0.5 * x * (1.0 + lax.erf(x * (1.0 / math.sqrt(2.0))))


# ---------------------------------------------------------------------------
# Kernels
# ---------------------------------------------------------------------------
def _mlp_resident_kernel(x_ref, w_ref, b_ref, o_ref):
    # x_ref: (TB, Hp) f32
    # w_ref: (L, Hp, Hp) bf16  -- whole weight stack resident in VMEM
    # b_ref: (L, 1, Hp)  f32   -- whole bias stack resident in VMEM
    # o_ref: (TB, Hp) f32
    n_layers = w_ref.shape[0]
    h = x_ref[...].astype(jnp.bfloat16)

    def layer(l, h_bf16):
        y = jnp.dot(h_bf16, w_ref[l], preferred_element_type=jnp.float32) + b_ref[l]
        return _gelu_exact(y)  # f32

    if n_layers <= _UNROLL_LAYER_LIMIT:
        g = None
        for l in range(n_layers):
            g = layer(l, h)
            h = g.astype(jnp.bfloat16)
        o_ref[...] = g.astype(o_ref.dtype)
    else:
        def body(l, carry):
            return layer(l, carry).astype(jnp.bfloat16)

        h = lax.fori_loop(0, n_layers - 1, body, h)
        o_ref[...] = layer(n_layers - 1, h).astype(o_ref.dtype)


def _mlp_streamed_kernel(x_ref, w_ref, b_ref, o_ref, h_ref):
    # x_ref: (TB, Hp) f32
    # w_ref: (1, Hp, Hp) bf16  -- one layer streamed per grid step (double-buffered)
    # b_ref: (L, 1, Hp)  f32   -- whole bias stack resident in VMEM
    # o_ref: (TB, Hp) f32
    # h_ref: (TB, Hp) bf16 VMEM scratch -- activation carried across the layer axis
    l = pl.program_id(1)

    @pl.when(l == 0)
    def _():
        h_ref[...] = x_ref[...].astype(jnp.bfloat16)

    y = jnp.dot(h_ref[...], w_ref[0], preferred_element_type=jnp.float32) + b_ref[l]
    g = _gelu_exact(y)  # f32
    h_ref[...] = g.astype(jnp.bfloat16)

    @pl.when(l == pl.num_programs(1) - 1)
    def _():
        o_ref[...] = g.astype(o_ref.dtype)


# ---------------------------------------------------------------------------
# Wrapper
# ---------------------------------------------------------------------------
def presidential_mlp(x, w_p, b_p, *, hidden_size):
    """Forward pass.

    x:   (B, H) input.
    w_p: (L, Hp, Hp) bf16 padded weights, laid out (in, out)  -- from prepare_params.
    b_p: (L, 1, Hp)  f32  padded biases                        -- from prepare_params.
    """
    B = x.shape[0]
    L, Hp, _ = w_p.shape
    H = hidden_size

    w_bytes = L * Hp * Hp * 2  # bf16 weight stack
    b_bytes = L * Hp * 4       # f32 bias stack (resident in both paths)
    b_rounded = _round_up(B, 8)

    # ---- plan: resident weights if they fit, else streamed ------------------
    # (conservatively count a 2x Pallas buffering factor on every input/output)
    resident_fixed = 2 * (w_bytes + b_bytes)
    per_row_resident = 4 * Hp * 4  # x + out, f32, double-buffered
    if resident_fixed < _VMEM_BUDGET:
        tb_resident = ((_VMEM_BUDGET - resident_fixed) // per_row_resident) // 8 * 8
    else:
        tb_resident = 0

    if tb_resident >= 8:
        # ----------------------- resident-weight path ------------------------
        tile_b = min(tb_resident, b_rounded, 1024)
        if B >= 16:
            # Keep >= 2 batch tiles so the "parallel" axis can shard across the
            # two v7x TensorCores (weights are resident -> no extra HBM traffic).
            tile_b = min(tile_b, _round_up(-(-B // 2), 8))
        tile_b = max(tile_b, 8)
        B_pad = _round_up(B, tile_b)

        x_p = jnp.zeros((B_pad, Hp), jnp.float32).at[:B, :H].set(
            x.astype(jnp.float32))

        vmem_needed = resident_fixed + 4 * tile_b * Hp * 4
        vmem_limit = int(min(vmem_needed + 4 * _MIB, 60 * _MIB))

        out = pl.pallas_call(
            _mlp_resident_kernel,
            out_shape=jax.ShapeDtypeStruct((B_pad, Hp), jnp.float32),
            grid_spec=pltpu.PrefetchScalarGridSpec(
                num_scalar_prefetch=0,
                grid=(B_pad // tile_b,),
                in_specs=[
                    # activations: tiled over batch
                    pl.BlockSpec((tile_b, Hp), lambda i: (i, 0)),
                    # whole weight / bias stacks resident (constant index_map)
                    pl.BlockSpec((L, Hp, Hp), lambda i: (0, 0, 0)),
                    pl.BlockSpec((L, 1, Hp), lambda i: (0, 0, 0)),
                ],
                out_specs=pl.BlockSpec((tile_b, Hp), lambda i: (i, 0)),
            ),
            compiler_params=pltpu.CompilerParams(
                dimension_semantics=("parallel",),
                vmem_limit_bytes=vmem_limit,
            ),
        )(x_p, w_p, b_p)
    else:
        # ----------------------- streamed-weight path ------------------------
        # TODO(synk): add an N-tiled weight path (grid (batch, layer, n)) for Hp
        # so large that even one double-buffered (Hp, Hp) bf16 block exceeds VMEM
        # (Hp >~ 3.5k on v7x); below assumes a single layer block fits.
        streamed_fixed = 2 * (2 * Hp * Hp) + 2 * b_bytes       # w dbuf (bf16) + bias
        per_row_streamed = 4 * Hp * 4 + Hp * 2                 # x/out f32 dbuf + bf16 carry
        tb_budget = max((_VMEM_BUDGET - streamed_fixed) // per_row_streamed, 8)
        tile_b = max(8, min((tb_budget // 8) * 8, b_rounded, 2048))
        B_pad = _round_up(B, tile_b)

        x_p = jnp.zeros((B_pad, Hp), jnp.float32).at[:B, :H].set(
            x.astype(jnp.float32))

        vmem_needed = streamed_fixed + tile_b * per_row_streamed
        vmem_limit = int(min(vmem_needed + 4 * _MIB, 60 * _MIB))

        out = pl.pallas_call(
            _mlp_streamed_kernel,
            out_shape=jax.ShapeDtypeStruct((B_pad, Hp), jnp.float32),
            grid_spec=pltpu.PrefetchScalarGridSpec(
                num_scalar_prefetch=0,
                grid=(B_pad // tile_b, L),
                in_specs=[
                    # activations: tiled over batch, constant across the layer axis
                    pl.BlockSpec((tile_b, Hp), lambda i, l: (i, 0)),
                    # weights: one layer streamed per grid step (double-buffered)
                    pl.BlockSpec((1, Hp, Hp), lambda i, l: (l, 0, 0)),
                    # biases: whole stack resident
                    pl.BlockSpec((L, 1, Hp), lambda i, l: (0, 0, 0)),
                ],
                out_specs=pl.BlockSpec((tile_b, Hp), lambda i, l: (i, 0)),
                scratch_shapes=[pltpu.VMEM((tile_b, Hp), jnp.bfloat16)],
            ),
            compiler_params=pltpu.CompilerParams(
                dimension_semantics=("parallel", "arbitrary"),
                vmem_limit_bytes=vmem_limit,
            ),
        )(x_p, w_p, b_p)

    return out[:B, :H].astype(x.dtype)


# ---------------------------------------------------------------------------
# Parameter preparation (done ONCE, hoisted out of the per-call path)
# ---------------------------------------------------------------------------
def prepare_params(weights, biases):
    """Pad hidden dim up to a lane-dense multiple of 128 and cast weights to bf16.

    weights: (L, H, H) laid out (in, out); biases: (L, H).
    Returns (w_p: (L, Hp, Hp) bf16,  b_p: (L, 1, Hp) f32).
    """
    L, H, _ = weights.shape
    Hp = _round_up(max(H, 128), 128)
    w_p = jnp.zeros((L, Hp, Hp), jnp.bfloat16).at[:, :H, :H].set(
        weights.astype(jnp.bfloat16))
    b_p = jnp.zeros((L, 1, Hp), jnp.float32).at[:, 0, :H].set(
        biases.astype(jnp.float32))
    return w_p, b_p


def init_params(key, hidden_size, n_mlp_layers):
    """Deterministic init mimicking nn.Linear default (uniform +-1/sqrt(fan_in))."""
    bound = 1.0 / math.sqrt(hidden_size)
    kw, kb = jax.random.split(key)
    # PyTorch stores W as (out, in); pre-transpose to (in, out) per layer.
    w_torch = jax.random.uniform(
        kw, (n_mlp_layers, hidden_size, hidden_size), jnp.float32, -bound, bound
    )
    weights = jnp.transpose(w_torch, (0, 2, 1))  # (L, in, out)
    biases = jax.random.uniform(
        kb, (n_mlp_layers, hidden_size), jnp.float32, -bound, bound
    )
    return weights, biases


if __name__ == "__main__":
    hidden_size = 32
    n_mlp_layers = 3
    batch = 8

    key = jax.random.PRNGKey(0)
    kx, kp = jax.random.split(key)

    x = jax.random.normal(kx, (batch, hidden_size), jnp.float32)
    weights, biases = init_params(kp, hidden_size, n_mlp_layers)

    # Pad / cast parameters once (hoisted out of the forward path).
    w_p, b_p = prepare_params(weights, biases)

    fwd = jax.jit(functools.partial(presidential_mlp, hidden_size=hidden_size))
    out = fwd(x, w_p, b_p)
    jax.block_until_ready(out)
    assert out.shape == (batch, hidden_size)

    # Pure-JAX reference with the same bf16-matmul / f32-accumulate / f32-GELU
    # precision policy as the kernel.
    h = x
    for l in range(n_mlp_layers):
        y = jnp.dot(h.astype(jnp.bfloat16), weights[l].astype(jnp.bfloat16),
                    preferred_element_type=jnp.float32) + biases[l]
        h = 0.5 * y * (1.0 + lax.erf(y / math.sqrt(2.0)))

    assert jnp.allclose(out, h, atol=2e-3, rtol=2e-3), "mismatch vs reference"

    print("KERNEL_OK")
</pallas_src>

<mosaic_0001>
module attributes {stable_mosaic.version = 11 : i64} {
  func.func @_mlp_resident_kernel(%arg0: i32, %arg1: memref<8x128xf32, #tpu.memory_space<vmem>>, %arg2: memref<3x128x128xbf16, #tpu.memory_space<vmem>>, %arg3: memref<3x1x128xf32, #tpu.memory_space<vmem>>, %arg4: memref<8x128xf32, #tpu.memory_space<vmem>>) attributes {dimension_semantics = [#tpu.dimension_semantics<parallel>], iteration_bounds = array<i64: 1>, scalar_prefetch = 0 : i64, scratch_operands = 0 : i64, tpu.core_type = #tpu.core_type<tc>, window_params = [{transform_indices = @transform_0, window_bounds = array<i64: 8, 128>}, {pipeline_mode = #tpu.pipeline_mode<synchronous>, transform_indices = @transform_1, window_bounds = array<i64: 3, 128, 128>}, {pipeline_mode = #tpu.pipeline_mode<synchronous>, transform_indices = @transform_2, window_bounds = array<i64: 3, 1, 128>}, {transform_indices = @transform_3, window_bounds = array<i64: 8, 128>}]} {
    %c0 = arith.constant 0 : index
    %c0_0 = arith.constant 0 : index
    %0 = vector.load %arg1[%c0, %c0_0] : memref<8x128xf32, #tpu.memory_space<vmem>>, vector<8x128xf32>
    %1 = arith.truncf %0 : vector<8x128xf32> to vector<8x128xbf16>
    %c0_1 = arith.constant 0 : index
    %c0_2 = arith.constant 0 : index
    %c0_3 = arith.constant 0 : index
    %2 = vector.load %arg2[%c0_1, %c0_2, %c0_3] : memref<3x128x128xbf16, #tpu.memory_space<vmem>>, vector<1x128x128xbf16>
    %3 = vector.shape_cast %2 : vector<1x128x128xbf16> to vector<128x128xbf16>
    %cst = arith.constant dense<0.000000e+00> : vector<8x128xf32>
    %4 = tpu.matmul %1, %3, %cst {dimension_numbers = #tpu.dot_dimension_numbers<[1], [0], [0], [1], [0, 0, 1, 1], [], []>} : vector<8x128xbf16>, vector<128x128xbf16>, vector<8x128xf32> -> vector<8x128xf32>
    %c0_4 = arith.constant 0 : index
    %c0_5 = arith.constant 0 : index
    %c0_6 = arith.constant 0 : index
    %5 = vector.load %arg3[%c0_4, %c0_5, %c0_6] : memref<3x1x128xf32, #tpu.memory_space<vmem>>, vector<1x1x128xf32>
    %6 = vector.shape_cast %5 : vector<1x1x128xf32> to vector<1x128xf32>
    %7 = vector.broadcast %6 : vector<1x128xf32> to vector<8x128xf32>
    %8 = arith.addf %4, %7 : vector<8x128xf32>
    %cst_7 = arith.constant 5.000000e-01 : f32
    %9 = vector.broadcast %cst_7 : f32 to vector<8x128xf32>
    %10 = arith.mulf %9, %8 : vector<8x128xf32>
    %cst_8 = arith.constant 0.707106769 : f32
    %11 = vector.broadcast %cst_8 : f32 to vector<8x128xf32>
    %12 = arith.mulf %8, %11 : vector<8x128xf32>
    %13 = math.erf %12 : vector<8x128xf32>
    %cst_9 = arith.constant 1.000000e+00 : f32
    %14 = vector.broadcast %cst_9 : f32 to vector<8x128xf32>
    %15 = arith.addf %14, %13 : vector<8x128xf32>
    %16 = arith.mulf %10, %15 : vector<8x128xf32>
    %17 = arith.truncf %16 : vector<8x128xf32> to vector<8x128xbf16>
    %c1 = arith.constant 1 : index
    %c0_10 = arith.constant 0 : index
    %c0_11 = arith.constant 0 : index
    %18 = vector.load %arg2[%c1, %c0_10, %c0_11] : memref<3x128x128xbf16, #tpu.memory_space<vmem>>, vector<1x128x128xbf16>
    %19 = vector.shape_cast %18 : vector<1x128x128xbf16> to vector<128x128xbf16>
    %cst_12 = arith.constant dense<0.000000e+00> : vector<8x128xf32>
    %20 = tpu.matmul %17, %19, %cst_12 {dimension_numbers = #tpu.dot_dimension_numbers<[1], [0], [0], [1], [0, 0, 1, 1], [], []>} : vector<8x128xbf16>, vector<128x128xbf16>, vector<8x128xf32> -> vector<8x128xf32>
    %c1_13 = arith.constant 1 : index
    %c0_14 = arith.constant 0 : index
    %c0_15 = arith.constant 0 : index
    %21 = vector.load %arg3[%c1_13, %c0_14, %c0_15] : memref<3x1x128xf32, #tpu.memory_space<vmem>>, vector<1x1x128xf32>
    %22 = vector.shape_cast %21 : vector<1x1x128xf32> to vector<1x128xf32>
    %23 = vector.broadcast %22 : vector<1x128xf32> to vector<8x128xf32>
    %24 = arith.addf %20, %23 : vector<8x128xf32>
    %cst_16 = arith.constant 5.000000e-01 : f32
    %25 = vector.broadcast %cst_16 : f32 to vector<8x128xf32>
    %26 = arith.mulf %25, %24 : vector<8x128xf32>
    %cst_17 = arith.constant 0.707106769 : f32
    %27 = vector.broadcast %cst_17 : f32 to vector<8x128xf32>
    %28 = arith.mulf %24, %27 : vector<8x128xf32>
    %29 = math.erf %28 : vector<8x128xf32>
    %cst_18 = arith.constant 1.000000e+00 : f32
    %30 = vector.broadcast %cst_18 : f32 to vector<8x128xf32>
    %31 = arith.addf %30, %29 : vector<8x128xf32>
    %32 = arith.mulf %26, %31 : vector<8x128xf32>
    %33 = arith.truncf %32 : vector<8x128xf32> to vector<8x128xbf16>
    %c2 = arith.constant 2 : index
    %c0_19 = arith.constant 0 : index
    %c0_20 = arith.constant 0 : index
    %34 = vector.load %arg2[%c2, %c0_19, %c0_20] : memref<3x128x128xbf16, #tpu.memory_space<vmem>>, vector<1x128x128xbf16>
    %35 = vector.shape_cast %34 : vector<1x128x128xbf16> to vector<128x128xbf16>
    %cst_21 = arith.constant dense<0.000000e+00> : vector<8x128xf32>
    %36 = tpu.matmul %33, %35, %cst_21 {dimension_numbers = #tpu.dot_dimension_numbers<[1], [0], [0], [1], [0, 0, 1, 1], [], []>} : vector<8x128xbf16>, vector<128x128xbf16>, vector<8x128xf32> -> vector<8x128xf32>
    %c2_22 = arith.constant 2 : index
    %c0_23 = arith.constant 0 : index
    %c0_24 = arith.constant 0 : index
    %37 = vector.load %arg3[%c2_22, %c0_23, %c0_24] : memref<3x1x128xf32, #tpu.memory_space<vmem>>, vector<1x1x128xf32>
    %38 = vector.shape_cast %37 : vector<1x1x128xf32> to vector<1x128xf32>
    %39 = vector.broadcast %38 : vector<1x128xf32> to vector<8x128xf32>
    %40 = arith.addf %36, %39 : vector<8x128xf32>
    %cst_25 = arith.constant 5.000000e-01 : f32
    %41 = vector.broadcast %cst_25 : f32 to vector<8x128xf32>
    %42 = arith.mulf %41, %40 : vector<8x128xf32>
    %cst_26 = arith.constant 0.707106769 : f32
    %43 = vector.broadcast %cst_26 : f32 to vector<8x128xf32>
    %44 = arith.mulf %40, %43 : vector<8x128xf32>
    %45 = math.erf %44 : vector<8x128xf32>
    %cst_27 = arith.constant 1.000000e+00 : f32
    %46 = vector.broadcast %cst_27 : f32 to vector<8x128xf32>
    %47 = arith.addf %46, %45 : vector<8x128xf32>
    %48 = arith.mulf %42, %47 : vector<8x128xf32>
    %c0_28 = arith.constant 0 : index
    %c0_29 = arith.constant 0 : index
    %49 = vector.load %arg4[%c0_28, %c0_29] : memref<8x128xf32, #tpu.memory_space<vmem>>, vector<8x128xf32>
    tpu.vector_store %arg4[%c0_28, %c0_29], %48 {strides = array<i32>} : memref<8x128xf32, #tpu.memory_space<vmem>>, vector<8x128xf32>,
    return
  }
  func.func @transform_0(%arg0: i32) -> (i32, i32) {
    %c0_i32 = arith.constant 0 : i32
    %c0_i32_0 = arith.constant 0 : i32
    return %arg0, %c0_i32 : i32, i32
  }
  func.func @transform_1(%arg0: i32) -> (i32, i32, i32) {
    %c0_i32 = arith.constant 0 : i32
    %c0_i32_0 = arith.constant 0 : i32
    %c0_i32_1 = arith.constant 0 : i32
    %c0_i32_2 = arith.constant 0 : i32
    return %c0_i32, %c0_i32_0, %c0_i32_1 : i32, i32, i32
  }
  func.func @transform_2(%arg0: i32) -> (i32, i32, i32) {
    %c0_i32 = arith.constant 0 : i32
    %c0_i32_0 = arith.constant 0 : i32
    %c0_i32_1 = arith.constant 0 : i32
    %c0_i32_2 = arith.constant 0 : i32
    return %c0_i32, %c0_i32_0, %c0_i32_1 : i32, i32, i32
  }
  func.func @transform_3(%arg0: i32) -> (i32, i32) {
    %c0_i32 = arith.constant 0 : i32
    %c0_i32_0 = arith.constant 0 : i32
    return %arg0, %c0_i32 : i32, i32
  }
}

</mosaic_0001>

<bundles_post_ra>
// kernel: presidential_mlp.1
= control target key start
LH: loop header
LB: loop body
LE: loop exit
PB: predicated region body
PF: predicated region fallthrough
CT: control target
= control target key end

     0   :  { %8 = vsyncpa [#allocation3], 0  ;;  %s672_s0 = inlined_call_operand.vmem [shape: f32[8,128], index: 0, kind: input, shape index: {}]   ;;  %s673_s1 = inlined_call_operand.hbm [shape: bf16[3,128,128], index: 1, kind: input, shape index: {}]   ;;  %s674_s2 = inlined_call_operand.vmem [shape: f32[3,1,128], index: 2, kind: input, shape index: {}]   ;;  %s675_s3 = inlined_call_operand.hbm [shape: f32[8,128], index: 3, kind: output, shape index: {}]  }
   0x1   :  { %9 = vsyncpa [#allocation4], 0  ;;  %s598_s12 = smov [#allocation2]  }
   0x2   :  { %s17_s13 = sshll.u32 %s598_s12, 4  ;;  %s18_s13 = int_to_ptr.vmem [resolvable:$true] %s17_s13 }
   0x3   :  { %s562_s14 = scalar_lea.vmem %s18_s13, 3072  ;;  %p567_p1 = scmp.lt.s32.totalorder %s18_s13, %s18_s13 }
   0x4   :  { %p563_p0 = scmp.ne.s32.totalorder %s18_s13, %s562_s14  ;;  %p568_p2 = scmp.lt.s32.totalorder %s562_s14, %s562_s14 }
   0x6   :  { %p569_p3 = por %p568_p2, %p567_p1 }
   0x8   :  { %p570_p4 = pnand %p569_p3, %p563_p0 }
   0xa   :  { %573 = shalt.err (!%p570_p4)
}
   0xb   :  { %s599_s15 = smov 64   ;;  %s600_s16 = smov 4  }
   0xc   :  { %23 = dma.hbm_to_vmem [thread:$0]  %s673_s1, 3072, %s18_s13, [#allocation3], %s599_s15, %s599_s15, %s600_s16  }
   0xd   :  { %594 = dma.done.wait [#allocation3], 3072  }
   0xe   :  { %595 = vsyncadd [#allocation3], 4294964224  ;;  %v601_v0 = vmov 0.0   ;;  %vm602_vm0 = vmmov 0   ;;  %v524_v1 = vld [vmem:[#allocation2 + $0x38] sm:$0xff]   ;;  %v525_v2 = vld [vmem:[#allocation2 + $0x30] sm:$0xff]  }
   0xf   :  { %458 = vmatprep.subr.bf16.mxu0 %v601_v0  ;;  %474 = vmatprep.mubr.msk.bf16.mxu0 %vm602_vm0, %v601_v0  ;;  %v526_v3 = vld [vmem:[#allocation2 + $0x28] sm:$0xff]   ;;  %v532_v4 = vld [vmem:[#allocation2 + $0x78] sm:$0xff]   ;;  %v527_v5 = vld [vmem:[#allocation2 + $0x20] sm:$0xff]   ;;  %s603_s25 = smov [#allocation5]  }
  0x10   :  { %478 = vmatprep.subr.bf16.mxu1 %v601_v0  ;;  %494 = vmatprep.mubr.msk.bf16.mxu1 %vm602_vm0, %v601_v0  ;;  %v533_v6 = vld [vmem:[#allocation2 + $0x70] sm:$0xff]   ;;  %v528_v7 = vld [vmem:[#allocation2 + $0x18] sm:$0xff]   ;;  %v530_v9 = vld [vmem:[#allocation2 + $0x8] sm:$0xff]   ;;  %s393_s26 = sshll.u32 %s603_s25, 4  ;;  %s394_s26 = int_to_ptr.vmem [resolvable:$true] %s393_s26 }
  0x11   :  { %459 = vmatpush3.bf16.msra.mxu0 %v524_v1  ;;  %479 = vmatpush3.bf16.msra.mxu1 %v532_v4  ;;  %v529_v8 = vld [vmem:[#allocation2 + $0x10] sm:$0xff]   ;;  %v531_v10 = vld [vmem:[#allocation2] sm:$0xff]   ;;  %v534_v13 = vld [vmem:[#allocation2 + $0x68] sm:$0xff]   ;;  %s574_s27 = scalar_lea.vmem %s394_s26, 128  ;;  %p579_p6 = scmp.lt.s32.totalorder %s394_s26, %s394_s26 }
  0x12   :  { %460 = vmatprep.subr.bf16.mxu0 %v601_v0  ;;  %480 = vmatprep.subr.bf16.mxu1 %v601_v0  ;;  %v30_v11 = vld [vmem:[%s672_s0] sm:$0xff]  ;;  %v536_v15 = vld [vmem:[#allocation2 + $0x58] sm:$0xff]   ;;  %v537_v16 = vld [vmem:[#allocation2 + $0x50] sm:$0xff]   ;;  %p575_p5 = scmp.ne.s32.totalorder %s394_s26, %s574_s27  ;;  %p580_p7 = scmp.lt.s32.totalorder %s574_s27, %s574_s27 }
  0x13   :  { %v31_v12 = vpack.c.bf16 %v30_v11, %v30_v11  ;;  %v535_v14 = vld [vmem:[#allocation2 + $0x60] sm:$0xff]   ;;  %v538_v17 = vld [vmem:[#allocation2 + $0x48] sm:$0xff]   ;;  %v540_v19 = vld [vmem:[#allocation2 + $0xb8] sm:$0xff]  }
  0x14   :  { %v539_v18 = vld [vmem:[#allocation2 + $0x40] sm:$0xff]   ;;  %v541_v20 = vld [vmem:[#allocation2 + $0xb0] sm:$0xff]   ;;  %v542_v33 = vld [vmem:[#allocation2 + $0xa8] sm:$0xff]   ;;  %p581_p8 = por %p580_p7, %p579_p6 }
  0x15   :  { %461 = vmatpush3.bf16.msra.mxu0 %v525_v2  ;;  %481 = vmatpush3.bf16.msra.mxu1 %v533_v6  ;;  %v402_v21 = vld [vmem:[%s674_s2] ss:$0 sm:$0xff]  ;;  %v544_v35 = vld [vmem:[#allocation2 + $0x98] sm:$0xff]   ;;  %v545_v36 = vld [vmem:[#allocation2 + $0x90] sm:$0xff]  }
  0x16   :  { %462 = vmatprep.subr.bf16.mxu0 %v601_v0  ;;  %482 = vmatprep.subr.bf16.mxu1 %v601_v0  ;;  %v543_v34 = vld [vmem:[#allocation2 + $0xa0] sm:$0xff]   ;;  %v546_v37 = vld [vmem:[#allocation2 + $0x88] sm:$0xff]   ;;  %p582_p9 = pnand %p581_p8, %p575_p5 }
  0x17   :  { %v547_v38 = vld [vmem:[#allocation2 + $0x80] sm:$0xff]  }
  0x18   :  { %v412_v39 = vld [vmem:[%s674_s2 + $0x1] ss:$0 sm:$0xff]  ;;  %v422_v51 = vld [vmem:[%s674_s2 + $0x2] ss:$0 sm:$0xff] }
  0x19   :  { %463 = vmatpush3.bf16.msra.mxu0 %v526_v3  ;;  %483 = vmatpush3.bf16.msra.mxu1 %v534_v13 }
  0x1a   :  { %464 = vmatprep.subr.bf16.mxu0 %v601_v0  ;;  %484 = vmatprep.subr.bf16.mxu1 %v601_v0 }
  0x1d   :  { %465 = vmatpush3.bf16.msra.mxu0 %v527_v5  ;;  %485 = vmatpush3.bf16.msra.mxu1 %v535_v14 }
  0x1e   :  { %466 = vmatprep.subr.bf16.mxu0 %v601_v0  ;;  %486 = vmatprep.subr.bf16.mxu1 %v601_v0 }
  0x21   :  { %467 = vmatpush3.bf16.msra.mxu0 %v528_v7  ;;  %487 = vmatpush3.bf16.msra.mxu1 %v536_v15 }
  0x22   :  { %468 = vmatprep.subr.bf16.mxu0 %v601_v0  ;;  %488 = vmatprep.subr.bf16.mxu1 %v601_v0 }
  0x25   :  { %469 = vmatpush3.bf16.msra.mxu0 %v529_v8  ;;  %489 = vmatpush3.bf16.msra.mxu1 %v537_v16 }
  0x26   :  { %470 = vmatprep.subr.bf16.mxu0 %v601_v0  ;;  %490 = vmatprep.subr.bf16.mxu1 %v601_v0 }
  0x29   :  { %471 = vmatpush3.bf16.msra.mxu0 %v530_v9  ;;  %491 = vmatpush3.bf16.msra.mxu1 %v538_v17 }
  0x2a   :  { %472 = vmatprep.subr.bf16.mxu0 %v601_v0  ;;  %492 = vmatprep.subr.bf16.mxu1 %v601_v0 }
  0x2d   :  { %473 = vmatpush3.bf16.msra.mxu0 %v531_v10  ;;  %493 = vmatpush3.bf16.msra.mxu1 %v539_v18 }
  0x2e   :  { %498 = vmatprep.subr.bf16.mxu0 %v601_v0 }
  0x30   :  { %475 = vmatmul.mubr.bf16.vlgmr.msra.gmra.mxu0 %v31_v12 }
  0x31   :  { %514 = vmatprep.mubr.msk.bf16.mxu0 %vm602_vm0, %v601_v0  ;;  %499 = vmatpush3.bf16.msra.mxu0 %v540_v19 }
  0x32   :  { %500 = vmatprep.subr.bf16.mxu0 %v601_v0 }
  0x35   :  { %501 = vmatpush3.bf16.msra.mxu0 %v541_v20 }
  0x36   :  { %502 = vmatprep.subr.bf16.mxu0 %v601_v0 }
  0x39   :  { %503 = vmatpush3.bf16.msra.mxu0 %v542_v33 }
  0x3a   :  { %504 = vmatprep.subr.bf16.mxu0 %v601_v0 }
  0x3d   :  { %505 = vmatpush3.bf16.msra.mxu0 %v543_v34 }
  0x3e   :  { %506 = vmatprep.subr.bf16.mxu0 %v601_v0 }
  0x41   :  { %507 = vmatpush3.bf16.msra.mxu0 %v544_v35 }
  0x42   :  { %508 = vmatprep.subr.bf16.mxu0 %v601_v0 }
  0x45   :  { %509 = vmatpush3.bf16.msra.mxu0 %v545_v36 }
  0x46   :  { %510 = vmatprep.subr.bf16.mxu0 %v601_v0 }
  0x49   :  { %511 = vmatpush3.bf16.msra.mxu0 %v546_v37 }
  0x4a   :  { %512 = vmatprep.subr.bf16.mxu0 %v601_v0 }
  0x4d   :  { %513 = vmatpush3.bf16.msra.mxu0 %v547_v38 }
  0xf0   :  { %v137_v22 = vpop.f32.mrf.mxu0 }
  0xf1   :  { %v138_v23 = vadd.f32 %v402_v21, %v137_v22 }
  0xf2   :  { %v476_v24 = vpop.f32.mrf.mxu0 }
  0xf3   :  { %v144_v25 = vmul.f32 0.70710677, %v138_v23  ;;  %v143_v29 = vmul.f32 0.5, %v138_v23 }
  0xf4   :  { %v140_v26 = vpop.f32.mrf.mxu0 }
  0xf5   :  { %548 = verf.f32 %v144_v25 }
  0xf6   :  { %v477_v27 = vpop.f32.mrf.mxu0 }
 0x102   :  { %v549_v28 = vpop.eup %548 }
 0x103   :  { %v146_v30 = vadd.f32 1.0, %v549_v28 }
 0x105   :  { %v147_v31 = vmul.f32 %v146_v30, %v143_v29 }
 0x107   :  { %v148_v32 = vpack.c.bf16 %v147_v31, %v147_v31 }
 0x109   :  { %495 = vmatmul.mubr.bf16.vlgmr.msra.gmra.mxu1 %v148_v32 }
 0x1c9   :  { %v256_v40 = vpop.f32.mrf.mxu1 }
 0x1ca   :  { %v257_v41 = vadd.f32 %v412_v39, %v256_v40 }
 0x1cb   :  { %v496_v42 = vpop.f32.mrf.mxu1 }
 0x1cc   :  { %v263_v43 = vmul.f32 0.70710677, %v257_v41  ;;  %v262_v47 = vmul.f32 0.5, %v257_v41 }
 0x1cd   :  { %v259_v44 = vpop.f32.mrf.mxu1 }
 0x1ce   :  { %550 = verf.f32 %v263_v43 }
 0x1cf   :  { %v497_v45 = vpop.f32.mrf.mxu1 }
 0x1db   :  { %v551_v46 = vpop.eup %550 }
 0x1dc   :  { %v265_v48 = vadd.f32 1.0, %v551_v46 }
 0x1de   :  { %v266_v49 = vmul.f32 %v265_v48, %v262_v47 }
 0x1e0   :  { %v267_v50 = vpack.c.bf16 %v266_v49, %v266_v49 }
 0x1e2   :  { %515 = vmatmul.mubr.bf16.vlgmr.msra.gmra.mxu0 %v267_v50 }
 0x2a2   :  { %v375_v52 = vpop.f32.mrf.mxu0 }
 0x2a3   :  { %v376_v53 = vadd.f32 %v422_v51, %v375_v52 }
 0x2a4   :  { %v516_v54 = vpop.f32.mrf.mxu0 }
 0x2a5   :  { %v382_v55 = vmul.f32 0.70710677, %v376_v53  ;;  %v381_v59 = vmul.f32 0.5, %v376_v53 }
 0x2a6   :  { %v378_v56 = vpop.f32.mrf.mxu0 }
 0x2a7   :  { %552 = verf.f32 %v382_v55 }
 0x2a8   :  { %v517_v57 = vpop.f32.mrf.mxu0 }
 0x2b4   :  { %v553_v58 = vpop.eup %552 }
 0x2b5   :  { %v384_v60 = vadd.f32 1.0, %v553_v58 }
 0x2b7   :  { %v385_v61 = vmul.f32 %v384_v60, %v381_v59 }
 0x2b9   :  { %386 = vst [vmem:[#allocation5] sm:$0xff] %v385_v61 }
 0x2ba   :  { %585 = shalt.err (!%p582_p9)
}
 0x2bb   :  { %396 = dma.vmem_to_hbm [thread:$0]  %s394_s26, 128, %s675_s3, [#allocation4]  }
 0x2bc   :  { %596 = dma.done.wait [#allocation4], 128  }
 0x2bd   :  { %597 = vsyncadd [#allocation4], 4294967168 }
 0x2be   :  { %400 = vsyncpa [#allocation3], 1 }
 0x2bf   :  { %401 = vsyncpa [#allocation4], 1 }

</bundles_post_ra>
